<compile_context>
chip_gen: v7x
topology: tpu7x:2x2x1
jax: 0.10.0
libtpu: 0.0.40
codegen_flags: <defaults>
</compile_context>

<pallas_src>
import functools

import jax
import jax.numpy as jnp
from jax.experimental import pallas as pl
from jax.experimental.pallas import tpu as pltpu

HIDDEN = 128


def mlp_kernel(xT_ref, w1_ref, b1_ref, w2_ref, b2_ref, w3_ref, b3_ref, o_ref):
    # fc1: (128, D_in) @ (D_in, TILE_B) -> (128, TILE_B); f32 accumulation.
    # x^T is pre-cast to the MXU dtype in the wrapper, so no in-kernel cast.
    h = jnp.dot(w1_ref[...], xT_ref[...], preferred_element_type=jnp.float32)
    h = jnp.maximum(h + b1_ref[...], 0.0)

    # fc2 applied three times with SHARED weights (matches the PyTorch forward).
    w2 = w2_ref[...]
    compute_dtype = w2.dtype                        # MXU input dtype (bf16 or f32)
    b2b = jnp.broadcast_to(b2_ref[...], h.shape)    # hoisted: one broadcast, reused 3x
    for _ in range(3):
        h = jnp.dot(w2, h.astype(compute_dtype), preferred_element_type=jnp.float32)
        h = jnp.maximum(h + b2b, 0.0)               # elementwise stays f32 (v5e-safe)

    # fc3 (128 -> 1): VPU multiply + XLU sublane reduce instead of an N=1 matmul.
    # Result is lane-dense: (1, TILE_B) with batch along lanes.
    o = jnp.sum(h * w3_ref[...], axis=0, keepdims=True)
    o = jnp.maximum(o + b3_ref[0], 0.0)             # fc3 bias is a scalar in SMEM
    o_ref[...] = o.astype(o_ref.dtype)


def _pick_tile_b(batch):
    """Multiple of 128, capped at 1024, and small enough that batches > 128
    produce >=2 grid tiles so both v7x TensorCores get work."""
    half = pl.cdiv(batch, 2)
    half_rounded = ((half + 127) // 128) * 128
    return int(min(1024, max(128, half_rounded)))


def mlp_forward(x, params, *, tile_b=None, compute_dtype=jnp.bfloat16):
    """x: (B, D_in) float32. params: PyTorch-layout weights (see init_params)."""
    B, d_in = x.shape
    if tile_b is None:
        tile_b = _pick_tile_b(B)
    assert tile_b % 128 == 0, "tile_b must be a multiple of the 128-wide lane axis"
    b_padded = ((B + tile_b - 1) // tile_b) * tile_b
    num_tiles = b_padded // tile_b

    # Batch-on-lanes layout; pad batch up to a whole number of tiles and
    # pre-cast to the MXU feed dtype (halves the dominant HBM->VMEM stream).
    xT = jnp.pad(x.T, ((0, 0), (0, b_padded - B))).astype(compute_dtype)

    # MXU operands pre-cast once; biases / fc3 column stay f32 (VPU/XLU only).
    w1 = params["w1"].astype(compute_dtype)        # (128, D_in)
    w2 = params["w2"].astype(compute_dtype)        # (128, 128)
    b1, b2 = params["b1"], params["b2"]            # (128, 1) f32
    w3, b3 = params["w3"], params["b3"]            # (128, 1) f32, (1,) f32

    # VMEM budget: double-buffered x^T tile + weights + output row + headroom
    # for the (128, tile_b) f32 intermediate; cap at 48 MiB (v7x has 64 MiB/TC).
    itemsize = jnp.dtype(compute_dtype).itemsize
    working = (2 * d_in * tile_b * itemsize
               + (HIDDEN * d_in + HIDDEN * HIDDEN) * itemsize
               + 3 * HIDDEN * 4
               + 2 * tile_b * 4
               + 4 * HIDDEN * tile_b * 4)
    vmem_limit = int(min(48 * 1024 * 1024, max(32 * 1024 * 1024, 2 * working)))

    flops = 2 * b_padded * (d_in * HIDDEN + 3 * HIDDEN * HIDDEN + HIDDEN)
    bytes_accessed = sum(int(a.size) * a.dtype.itemsize
                         for a in (xT, w1, b1, w2, b2, w3, b3)) + b_padded * 4
    cost = pl.CostEstimate(flops=flops, transcendentals=0,
                           bytes_accessed=bytes_accessed)

    out = pl.pallas_call(
        mlp_kernel,
        out_shape=jax.ShapeDtypeStruct((1, b_padded), jnp.float32),
        grid=(num_tiles,),
        in_specs=[
            pl.BlockSpec((d_in, tile_b), lambda i: (0, i)),      # x^T batch tile
            pl.BlockSpec((HIDDEN, d_in), lambda i: (0, 0)),      # w1 (VMEM-resident)
            pl.BlockSpec((HIDDEN, 1), lambda i: (0, 0)),         # b1
            pl.BlockSpec((HIDDEN, HIDDEN), lambda i: (0, 0)),    # w2
            pl.BlockSpec((HIDDEN, 1), lambda i: (0, 0)),         # b2
            pl.BlockSpec((HIDDEN, 1), lambda i: (0, 0)),         # w3 column
            pl.BlockSpec(memory_space=pltpu.MemorySpace.SMEM),   # b3 scalar
        ],
        # Lane-dense output: sublane block dim == full extent (1), lane dim a
        # 128-multiple -> unmasked vst, simple writeback DMA.
        out_specs=pl.BlockSpec((1, tile_b), lambda i: (0, i)),
        compiler_params=pltpu.CompilerParams(
            dimension_semantics=("parallel",),
            vmem_limit_bytes=vmem_limit),
        cost_estimate=cost,
    )(xT, w1, b1, w2, b2, w3, b3)

    # (1, b_padded) -> (B, 1); pure layout plumbing.
    return out[0, :B].reshape(B, 1)


def init_params(key, input_layers):
    """Matches MLP.init_weights: Linear weights ~ U(-1e-4, 1e-4), biases zero.

    Weights are stored in PyTorch (out_features, in_features) layout; fc3's
    weight is stored as a (128, 1) column and its bias as a (1,) scalar.
    """
    k1, k2, k3 = jax.random.split(key, 3)
    return {
        "w1": jax.random.uniform(k1, (HIDDEN, input_layers), jnp.float32, -1e-4, 1e-4),
        "b1": jnp.zeros((HIDDEN, 1), jnp.float32),
        "w2": jax.random.uniform(k2, (HIDDEN, HIDDEN), jnp.float32, -1e-4, 1e-4),
        "b2": jnp.zeros((HIDDEN, 1), jnp.float32),
        "w3": jax.random.uniform(k3, (HIDDEN, 1), jnp.float32, -1e-4, 1e-4),
        "b3": jnp.zeros((1,), jnp.float32),
    }


def mlp_reference(x, p):
    dot = functools.partial(jnp.dot, precision=jax.lax.Precision.HIGHEST)
    h = jnp.maximum(dot(x, p["w1"].T) + p["b1"].T, 0.0)
    for _ in range(3):
        h = jnp.maximum(dot(h, p["w2"].T) + p["b2"].T, 0.0)
    return jnp.maximum(dot(h, p["w3"]) + p["b3"], 0.0)


if __name__ == "__main__":
    key = jax.random.PRNGKey(0)
    kx, kx2, kp = jax.random.split(key, 3)

    input_layers = 32
    params = init_params(kp, input_layers)

    # Small single-tile batch, default bf16-fed MXU (f32 accumulation).
    x = jax.random.normal(kx, (8, input_layers), jnp.float32)
    ref = mlp_reference(x, params)
    scale = float(jnp.max(jnp.abs(ref))) + 1e-30
    out = jax.block_until_ready(mlp_forward(x, params))
    assert out.shape == (8, 1)
    assert bool(jnp.allclose(out, ref, rtol=1.5e-1, atol=5e-2 * scale))

    # Ragged multi-tile batch: auto tile_b=256 -> 2 grid tiles (both v7x cores),
    # exercises padding and the lane-dense (1, b_padded) writeback.
    x2 = jax.random.normal(kx2, (300, input_layers), jnp.float32)
    ref2 = mlp_reference(x2, params)
    scale2 = float(jnp.max(jnp.abs(ref2))) + 1e-30
    out2 = jax.block_until_ready(mlp_forward(x2, params))
    assert out2.shape == (300, 1)
    assert bool(jnp.allclose(out2, ref2, rtol=1.5e-1, atol=5e-2 * scale2))

    # f32-fed MXU path with an explicit tile_b: tighter tolerance.
    out_f32 = jax.block_until_ready(
        mlp_forward(x2, params, tile_b=128, compute_dtype=jnp.float32))
    assert out_f32.shape == (300, 1)
    assert bool(jnp.allclose(out_f32, ref2, rtol=2e-2, atol=1e-3 * scale2))

    print("KERNEL_OK")
</pallas_src>

<mosaic_0001>
module attributes {stable_mosaic.version = 11 : i64} {
  func.func @mlp_kernel(%arg0: i32, %arg1: memref<32x128xbf16, #tpu.memory_space<vmem>>, %arg2: memref<128x32xbf16, #tpu.memory_space<vmem>>, %arg3: memref<128x1xf32, #tpu.memory_space<vmem>>, %arg4: memref<128x128xbf16, #tpu.memory_space<vmem>>, %arg5: memref<128x1xf32, #tpu.memory_space<vmem>>, %arg6: memref<128x1xf32, #tpu.memory_space<vmem>>, %arg7: memref<1xf32, #tpu.memory_space<smem>>, %arg8: memref<1x128xf32, #tpu.memory_space<vmem>>) attributes {dimension_semantics = [#tpu.dimension_semantics<parallel>], iteration_bounds = array<i64: 1>, scalar_prefetch = 0 : i64, scratch_operands = 0 : i64, tpu.core_type = #tpu.core_type<tc>, window_params = [{transform_indices = @transform_0, window_bounds = array<i64: 32, 128>}, {pipeline_mode = #tpu.pipeline_mode<synchronous>, transform_indices = @transform_1, window_bounds = array<i64: 128, 32>}, {pipeline_mode = #tpu.pipeline_mode<synchronous>, transform_indices = @transform_2, window_bounds = array<i64: 128, 1>}, {pipeline_mode = #tpu.pipeline_mode<synchronous>, transform_indices = @transform_3, window_bounds = array<i64: 128, 128>}, {pipeline_mode = #tpu.pipeline_mode<synchronous>, transform_indices = @transform_4, window_bounds = array<i64: 128, 1>}, {pipeline_mode = #tpu.pipeline_mode<synchronous>, transform_indices = @transform_5, window_bounds = array<i64: 128, 1>}, {transform_indices = @transform_6, window_bounds = array<i64: 1>}, {transform_indices = @transform_7, window_bounds = array<i64: 1, 128>}]} {
    %c0 = arith.constant 0 : index
    %c0_0 = arith.constant 0 : index
    %0 = vector.load %arg2[%c0, %c0_0] : memref<128x32xbf16, #tpu.memory_space<vmem>>, vector<128x32xbf16>
    %c0_1 = arith.constant 0 : index
    %c0_2 = arith.constant 0 : index
    %1 = vector.load %arg1[%c0_1, %c0_2] : memref<32x128xbf16, #tpu.memory_space<vmem>>, vector<32x128xbf16>
    %cst = arith.constant dense<0.000000e+00> : vector<128x128xf32>
    %2 = tpu.matmul %0, %1, %cst {dimension_numbers = #tpu.dot_dimension_numbers<[1], [0], [0], [1], [0, 0, 1, 1], [], []>} : vector<128x32xbf16>, vector<32x128xbf16>, vector<128x128xf32> -> vector<128x128xf32>
    %c0_3 = arith.constant 0 : index
    %c0_4 = arith.constant 0 : index
    %3 = vector.load %arg3[%c0_3, %c0_4] : memref<128x1xf32, #tpu.memory_space<vmem>>, vector<128x1xf32>
    %4 = vector.broadcast %3 : vector<128x1xf32> to vector<128x128xf32>
    %5 = arith.addf %2, %4 : vector<128x128xf32>
    %cst_5 = arith.constant 0.000000e+00 : f32
    %6 = vector.broadcast %cst_5 : f32 to vector<128x128xf32>
    %7 = arith.maximumf %5, %6 : vector<128x128xf32>
    %c0_6 = arith.constant 0 : index
    %c0_7 = arith.constant 0 : index
    %8 = vector.load %arg4[%c0_6, %c0_7] : memref<128x128xbf16, #tpu.memory_space<vmem>>, vector<128x128xbf16>
    %c0_8 = arith.constant 0 : index
    %c0_9 = arith.constant 0 : index
    %9 = vector.load %arg5[%c0_8, %c0_9] : memref<128x1xf32, #tpu.memory_space<vmem>>, vector<128x1xf32>
    %10 = vector.shape_cast %9 : vector<128x1xf32> to vector<128x1xf32>
    %11 = vector.broadcast %10 : vector<128x1xf32> to vector<128x128xf32>
    %12 = arith.truncf %7 : vector<128x128xf32> to vector<128x128xbf16>
    %cst_10 = arith.constant dense<0.000000e+00> : vector<128x128xf32>
    %13 = tpu.matmul %8, %12, %cst_10 {dimension_numbers = #tpu.dot_dimension_numbers<[1], [0], [0], [1], [0, 0, 1, 1], [], []>} : vector<128x128xbf16>, vector<128x128xbf16>, vector<128x128xf32> -> vector<128x128xf32>
    %14 = arith.addf %13, %11 : vector<128x128xf32>
    %cst_11 = arith.constant 0.000000e+00 : f32
    %15 = vector.broadcast %cst_11 : f32 to vector<128x128xf32>
    %16 = arith.maximumf %14, %15 : vector<128x128xf32>
    %17 = arith.truncf %16 : vector<128x128xf32> to vector<128x128xbf16>
    %cst_12 = arith.constant dense<0.000000e+00> : vector<128x128xf32>
    %18 = tpu.matmul %8, %17, %cst_12 {dimension_numbers = #tpu.dot_dimension_numbers<[1], [0], [0], [1], [0, 0, 1, 1], [], []>} : vector<128x128xbf16>, vector<128x128xbf16>, vector<128x128xf32> -> vector<128x128xf32>
    %19 = arith.addf %18, %11 : vector<128x128xf32>
    %cst_13 = arith.constant 0.000000e+00 : f32
    %20 = vector.broadcast %cst_13 : f32 to vector<128x128xf32>
    %21 = arith.maximumf %19, %20 : vector<128x128xf32>
    %22 = arith.truncf %21 : vector<128x128xf32> to vector<128x128xbf16>
    %cst_14 = arith.constant dense<0.000000e+00> : vector<128x128xf32>
    %23 = tpu.matmul %8, %22, %cst_14 {dimension_numbers = #tpu.dot_dimension_numbers<[1], [0], [0], [1], [0, 0, 1, 1], [], []>} : vector<128x128xbf16>, vector<128x128xbf16>, vector<128x128xf32> -> vector<128x128xf32>
    %24 = arith.addf %23, %11 : vector<128x128xf32>
    %cst_15 = arith.constant 0.000000e+00 : f32
    %25 = vector.broadcast %cst_15 : f32 to vector<128x128xf32>
    %26 = arith.maximumf %24, %25 : vector<128x128xf32>
    %c0_16 = arith.constant 0 : index
    %c0_17 = arith.constant 0 : index
    %27 = vector.load %arg6[%c0_16, %c0_17] : memref<128x1xf32, #tpu.memory_space<vmem>>, vector<128x1xf32>
    %28 = vector.broadcast %27 : vector<128x1xf32> to vector<128x128xf32>
    %29 = arith.mulf %26, %28 : vector<128x128xf32>
    %cst_18 = arith.constant dense<0.000000e+00> : vector<128xf32>
    %30 = vector.multi_reduction <add>, %29, %cst_18 [0] : vector<128x128xf32> to vector<128xf32>
    %31 = vector.shape_cast %30 : vector<128xf32> to vector<1x128xf32>
    %c0_19 = arith.constant 0 : index
    %32 = memref.load %arg7[%c0_19] : memref<1xf32, #tpu.memory_space<smem>>
    %33 = vector.broadcast %32 : f32 to vector<1x128xf32>
    %34 = arith.addf %31, %33 : vector<1x128xf32>
    %cst_20 = arith.constant 0.000000e+00 : f32
    %35 = vector.broadcast %cst_20 : f32 to vector<1x128xf32>
    %36 = arith.maximumf %34, %35 : vector<1x128xf32>
    %c0_21 = arith.constant 0 : index
    %c0_22 = arith.constant 0 : index
    %37 = vector.load %arg8[%c0_21, %c0_22] : memref<1x128xf32, #tpu.memory_space<vmem>>, vector<1x128xf32>
    tpu.vector_store %arg8[%c0_21, %c0_22], %36 {strides = array<i32>} : memref<1x128xf32, #tpu.memory_space<vmem>>, vector<1x128xf32>,
    return
  }
  func.func @transform_0(%arg0: i32) -> (i32, i32) {
    %c0_i32 = arith.constant 0 : i32
    %c0_i32_0 = arith.constant 0 : i32
    return %c0_i32, %arg0 : i32, i32
  }
  func.func @transform_1(%arg0: i32) -> (i32, i32) {
    %c0_i32 = arith.constant 0 : i32
    %c0_i32_0 = arith.constant 0 : i32
    %c0_i32_1 = arith.constant 0 : i32
    return %c0_i32, %c0_i32_0 : i32, i32
  }
  func.func @transform_2(%arg0: i32) -> (i32, i32) {
    %c0_i32 = arith.constant 0 : i32
    %c0_i32_0 = arith.constant 0 : i32
    %c0_i32_1 = arith.constant 0 : i32
    return %c0_i32, %c0_i32_0 : i32, i32
  }
  func.func @transform_3(%arg0: i32) -> (i32, i32) {
    %c0_i32 = arith.constant 0 : i32
    %c0_i32_0 = arith.constant 0 : i32
    %c0_i32_1 = arith.constant 0 : i32
    return %c0_i32, %c0_i32_0 : i32, i32
  }
  func.func @transform_4(%arg0: i32) -> (i32, i32) {
    %c0_i32 = arith.constant 0 : i32
    %c0_i32_0 = arith.constant 0 : i32
    %c0_i32_1 = arith.constant 0 : i32
    return %c0_i32, %c0_i32_0 : i32, i32
  }
  func.func @transform_5(%arg0: i32) -> (i32, i32) {
    %c0_i32 = arith.constant 0 : i32
    %c0_i32_0 = arith.constant 0 : i32
    %c0_i32_1 = arith.constant 0 : i32
    return %c0_i32, %c0_i32_0 : i32, i32
  }
  func.func @transform_6(%arg0: i32) -> i32 {
    %c0_i32 = arith.constant 0 : i32
    %c0_i32_0 = arith.constant 0 : i32
    return %c0_i32 : i32
  }
  func.func @transform_7(%arg0: i32) -> (i32, i32) {
    %c0_i32 = arith.constant 0 : i32
    %c0_i32_0 = arith.constant 0 : i32
    return %c0_i32, %arg0 : i32, i32
  }
}

</mosaic_0001>

<bundles_post_ra>
// kernel: tpu_custom_call.1
= control target key start
LH: loop header
LB: loop body
LE: loop exit
PB: predicated region body
PF: predicated region fallthrough
CT: control target
= control target key end

     0   :  { %v1272_v1 = vmov 0   ;;  %vm197_vm0 = vcmask 261120   ;;  %s1655_s0 = inlined_call_operand.vmem [shape: bf16[32,128], index: 0, kind: input, shape index: {}]   ;;  %s1656_s1 = inlined_call_operand.vmem [shape: bf16[128,32], index: 1, kind: input, shape index: {}]   ;;  %s1657_s2 = inlined_call_operand.vmem [shape: f32[128,1], index: 2, kind: input, shape index: {}]   ;;  %s1658_s3 = inlined_call_operand.vmem [shape: bf16[128,128], index: 3, kind: input, shape index: {}]   ;;  %s1659_s4 = inlined_call_operand.vmem [shape: f32[128,1], index: 4, kind: input, shape index: {}]   ;;  %s1660_s5 = inlined_call_operand.vmem [shape: f32[128,1], index: 5, kind: input, shape index: {}]   ;;  %s1661_s6 = inlined_call_operand.<no memory space> [shape: f32[1], index: 6, kind: input, shape index: {}]   ;;  %s1662_s7 = inlined_call_operand.hbm [shape: f32[1,128], index: 7, kind: output, shape index: {}]  }
   0x1   :  { %v49_v0 = vld [vmem:[%s1657_s2] sm:$0xff]  ;;  %1228 = vset.pattern.permute.xlu0 %v1272_v1  ;;  %1229 = vset.pattern.permute.xlu1 %v1272_v1  ;;  %v51_v3 = vld [vmem:[%s1657_s2 + $0x10] sm:$0xff]  ;;  %v1231_v4 = vld [vmem:[%s1655_s0 + $0x8] sm:$0xff]  }
   0x2   :  { %v1230_v2 = vld [vmem:[%s1655_s0] sm:$0xff]   ;;  %67 = vperm.xlu0 %1228, %v49_v0   ;;  %77 = vperm.xlu1 %1229, %v51_v3   ;;  %v50_v5 = vld [vmem:[%s1657_s2 + $0x8] sm:$0xff]  ;;  %v52_v6 = vld [vmem:[%s1657_s2 + $0x18] sm:$0xff] }
   0x3   :  { %1094 = vmatprep.subr.bf16.mxu0 %v1230_v2  ;;  %v1232_v7 = vld [vmem:[%s1656_s1] sm:$0xff]   ;;  %v1233_v9 = vld [vmem:[%s1656_s1 + $0x8] sm:$0xff]   ;;  %v1234_v11 = vld [vmem:[%s1656_s1 + $0x10] sm:$0xff]  }
   0x4   :  { %1095 = vmatpush3.bf16.msra.mxu0 %v1230_v2  ;;  %v53_v8 = vld [vmem:[%s1657_s2 + $0x20] sm:$0xff]  ;;  %1098 = vmatprep.mubr.msk.bf16.mxu0 %vm197_vm0, %v1232_v7  ;;  %v54_v10 = vld [vmem:[%s1657_s2 + $0x28] sm:$0xff]  ;;  %v55_v12 = vld [vmem:[%s1657_s2 + $0x30] sm:$0xff] }
   0x5   :  { %1096 = vmatprep.subr.bf16.mxu0 %v1231_v4  ;;  %v56_v13 = vld [vmem:[%s1657_s2 + $0x38] sm:$0xff]  ;;  %v57_v14 = vld [vmem:[%s1657_s2 + $0x40] sm:$0xff]  ;;  %v58_v16 = vld [vmem:[%s1657_s2 + $0x48] sm:$0xff] }
   0x6   :  { %72 = vperm.xlu0 %1228, %v50_v5   ;;  %82 = vperm.xlu1 %1229, %v52_v6   ;;  %v1235_v15 = vld [vmem:[%s1656_s1 + $0x18] sm:$0xff]   ;;  %v1236_v17 = vld [vmem:[%s1656_s1 + $0x20] sm:$0xff]   ;;  %v59_v18 = vld [vmem:[%s1657_s2 + $0x50] sm:$0xff] }
   0x7   :  { %v60_v19 = vld [vmem:[%s1657_s2 + $0x58] sm:$0xff]  ;;  %v61_v20 = vld [vmem:[%s1657_s2 + $0x60] sm:$0xff]  ;;  %v1237_v21 = vld [vmem:[%s1656_s1 + $0x28] sm:$0xff]  }
   0x8   :  { %1097 = vmatpush3.bf16.msra.mxu0 %v1231_v4  ;;  %v62_v22 = vld [vmem:[%s1657_s2 + $0x68] sm:$0xff]  ;;  %v1238_v23 = vld [vmem:[%s1656_s1 + $0x30] sm:$0xff]   ;;  %v64_v25 = vld [vmem:[%s1657_s2 + $0x78] sm:$0xff] }
   0x9   :  { %v63_v24 = vld [vmem:[%s1657_s2 + $0x70] sm:$0xff]  ;;  %v351_v26 = vld [vmem:[%s1659_s4] sm:$0xff]  ;;  %v1239_v27 = vld [vmem:[%s1656_s1 + $0x38] sm:$0xff]  }
   0xa   :  { %87 = vperm.xlu0 %1228, %v53_v8   ;;  %92 = vperm.xlu1 %1229, %v54_v10   ;;  %v352_v28 = vld [vmem:[%s1659_s4 + $0x8] sm:$0xff] }
   0xb   :  { %1099 = vmatmul.mubr.msk.bf16.vlgmr.msra.gmra.mrb[0].mxu0 %vm197_vm0, %v1233_v9 }
   0xc   :  { %1102 = vmatprep.mubr.msk.bf16.mxu0 %vm197_vm0, %v1234_v11 }
   0xe   :  { %97 = vperm.xlu0 %1228, %v55_v12   ;;  %102 = vperm.xlu1 %1229, %v56_v13  }
  0x12   :  { %107 = vperm.xlu0 %1228, %v57_v14   ;;  %112 = vperm.xlu1 %1229, %v58_v16  }
  0x13   :  { %1103 = vmatmul.mubr.msk.bf16.gmra.mrb[4].mxu0 %vm197_vm0, %v1235_v15 }
  0x14   :  { %1106 = vmatprep.mubr.msk.bf16.mxu0 %vm197_vm0, %v1236_v17 }
  0x16   :  { %117 = vperm.xlu0 %1228, %v59_v18   ;;  %122 = vperm.xlu1 %1229, %v60_v19  }
  0x1a   :  { %127 = vperm.xlu0 %1228, %v61_v20   ;;  %132 = vperm.xlu1 %1229, %v62_v22  }
  0x1b   :  { %1107 = vmatmul.mubr.msk.bf16.gmra.mrb[8].mxu0 %vm197_vm0, %v1237_v21 }
  0x1c   :  { %1110 = vmatprep.mubr.msk.bf16.mxu0 %vm197_vm0, %v1238_v23 }
  0x1e   :  { %137 = vperm.xlu0 %1228, %v63_v24   ;;  %142 = vperm.xlu1 %1229, %v64_v25  }
  0x1f   :  { %13 = vsyncpa [#allocation4], 0  ;;  %v353_v29 = vld [vmem:[%s1659_s4 + $0x10] sm:$0xff]  ;;  %v354_v30 = vld [vmem:[%s1659_s4 + $0x18] sm:$0xff]  ;;  %s1273_s28 = smov [#allocation3]  }
  0x20   :  { %v355_v31 = vld [vmem:[%s1659_s4 + $0x20] sm:$0xff]  ;;  %v356_v32 = vld [vmem:[%s1659_s4 + $0x28] sm:$0xff]  ;;  %v357_v33 = vld [vmem:[%s1659_s4 + $0x30] sm:$0xff]  ;;  %s1002_s29 = sshll.u32 %s1273_s28, 4  ;;  %s1003_s29 = int_to_ptr.vmem [resolvable:$true] %s1002_s29 }
  0x21   :  { %v358_v34 = vld [vmem:[%s1659_s4 + $0x38] sm:$0xff]  ;;  %v359_v35 = vld [vmem:[%s1659_s4 + $0x40] sm:$0xff]  ;;  %v360_v36 = vld [vmem:[%s1659_s4 + $0x48] sm:$0xff]  ;;  %s1248_s30 = scalar_lea.vmem %s1003_s29, 16  ;;  %s1252_s8 = scalar_lea.vmem %s1003_s29, 32 }
  0x22   :  { %369 = vperm.xlu0 %1228, %v351_v26   ;;  %374 = vperm.xlu1 %1229, %v352_v28   ;;  %v361_v37 = vld [vmem:[%s1659_s4 + $0x50] sm:$0xff]  ;;  %v362_v38 = vld [vmem:[%s1659_s4 + $0x58] sm:$0xff]  ;;  %v363_v39 = vld [vmem:[%s1659_s4 + $0x60] sm:$0xff]  ;;  %p1249_p0 = scmp.ne.s32.totalorder %s1003_s29, %s1248_s30  ;;  %p1253_p1 = scmp.lt.s32.totalorder %s1003_s29, %s1003_s29 }
  0x23   :  { %1111 = vmatmul.mubr.msk.bf16.gmra.mrb[12].mxu0 %vm197_vm0, %v1239_v27  ;;  %v364_v40 = vld [vmem:[%s1659_s4 + $0x68] sm:$0xff]  ;;  %v365_v41 = vld [vmem:[%s1659_s4 + $0x70] sm:$0xff]  ;;  %v366_v42 = vld [vmem:[%s1659_s4 + $0x78] sm:$0xff]  ;;  %p1254_p2 = scmp.lt.s32.totalorder %s1252_s8, %s1248_s30 }
  0x24   :  { %v858_v43 = vld [vmem:[%s1660_s5] sm:$0xff]  ;;  %v859_v44 = vld [vmem:[%s1660_s5 + $0x8] sm:$0xff]  ;;  %v860_v45 = vld [vmem:[%s1660_s5 + $0x10] sm:$0xff] }
  0x25   :  { %v861_v46 = vld [vmem:[%s1660_s5 + $0x18] sm:$0xff]  ;;  %v862_v47 = vld [vmem:[%s1660_s5 + $0x20] sm:$0xff]  ;;  %v863_v48 = vld [vmem:[%s1660_s5 + $0x28] sm:$0xff]  ;;  %p1255_p3 = por %p1254_p2, %p1253_p1 }
  0x26   :  { %379 = vperm.xlu0 %1228, %v353_v29   ;;  %384 = vperm.xlu1 %1229, %v354_v30   ;;  %v864_v49 = vld [vmem:[%s1660_s5 + $0x30] sm:$0xff]  ;;  %v865_v50 = vld [vmem:[%s1660_s5 + $0x38] sm:$0xff]  ;;  %v866_v51 = vld [vmem:[%s1660_s5 + $0x40] sm:$0xff] }
  0x27   :  { %v867_v52 = vld [vmem:[%s1660_s5 + $0x48] sm:$0xff]  ;;  %v868_v53 = vld [vmem:[%s1660_s5 + $0x50] sm:$0xff]  ;;  %v869_v54 = vld [vmem:[%s1660_s5 + $0x58] sm:$0xff]  ;;  %p1256_p4 = pnand %p1255_p3, %p1249_p0 }
  0x28   :  { %v870_v55 = vld [vmem:[%s1660_s5 + $0x60] sm:$0xff]  ;;  %v871_v56 = vld [vmem:[%s1660_s5 + $0x68] sm:$0xff]  ;;  %v872_v57 = vld [vmem:[%s1660_s5 + $0x70] sm:$0xff] }
  0x29   :  { %v873_v58 = vld [vmem:[%s1660_s5 + $0x78] sm:$0xff]  ;;  %v1499_v59 = vld [vmem:[%s1658_s3] sm:$0xff]  }
  0x2a   :  { %389 = vperm.xlu0 %1228, %v355_v31   ;;  %394 = vperm.xlu1 %1229, %v356_v32  }
  0x2b   :  { %1130 = vmatprep.mubr.bf16.mxu1 %v1499_v59  ;;  %1162 = vmatprep.mubr.bf16.mxu0 %v1499_v59 }
  0x2e   :  { %399 = vperm.xlu0 %1228, %v357_v33   ;;  %404 = vperm.xlu1 %1229, %v358_v34  }
  0x32   :  { %409 = vperm.xlu0 %1228, %v359_v35   ;;  %414 = vperm.xlu1 %1229, %v360_v36  }
  0x36   :  { %419 = vperm.xlu0 %1228, %v361_v37   ;;  %424 = vperm.xlu1 %1229, %v362_v38  }
  0x3a   :  { %429 = vperm.xlu0 %1228, %v363_v39   ;;  %434 = vperm.xlu1 %1229, %v364_v40  }
  0x3e   :  { %439 = vperm.xlu0 %1228, %v365_v41   ;;  %444 = vperm.xlu1 %1229, %v366_v42  }
  0x42   :  { %876 = vperm.xlu0 %1228, %v858_v43   ;;  %881 = vperm.xlu1 %1229, %v859_v44  }
  0x46   :  { %886 = vperm.xlu0 %1228, %v860_v45   ;;  %891 = vperm.xlu1 %1229, %v861_v46  }
  0x4a   :  { %896 = vperm.xlu0 %1228, %v862_v47   ;;  %901 = vperm.xlu1 %1229, %v863_v48  }
  0x4e   :  { %906 = vperm.xlu0 %1228, %v864_v49   ;;  %911 = vperm.xlu1 %1229, %v865_v50  }
  0x52   :  { %916 = vperm.xlu0 %1228, %v866_v51   ;;  %921 = vperm.xlu1 %1229, %v867_v52  }
  0x56   :  { %926 = vperm.xlu0 %1228, %v868_v53   ;;  %931 = vperm.xlu1 %1229, %v869_v54  }
  0x5a   :  { %936 = vperm.xlu0 %1228, %v870_v55   ;;  %941 = vperm.xlu1 %1229, %v871_v56  }
  0x5e   :  { %946 = vperm.xlu0 %1228, %v872_v57   ;;  %951 = vperm.xlu1 %1229, %v873_v58  }
  0x81   :  { %v68_v60 = vpop.permute.xlu0 %67  ;;  %v78_v61 = vpop.permute.xlu1 %77 }
  0x85   :  { %v73_v62 = vpop.permute.xlu0 %72  ;;  %v83_v63 = vpop.permute.xlu1 %82 }
  0x89   :  { %v88_v0 = vpop.permute.xlu0 %87  ;;  %v93_v1 = vpop.permute.xlu1 %92 }
  0x8d   :  { %v98_v2 = vpop.permute.xlu0 %97  ;;  %v103_v6 = vpop.permute.xlu1 %102 }
  0x91   :  { %v108_v14 = vpop.permute.xlu0 %107  ;;  %v113_v18 = vpop.permute.xlu1 %112 }
  0x95   :  { %v118_v27 = vpop.permute.xlu0 %117  ;;  %v123_v31 = vpop.permute.xlu1 %122 }
  0x99   :  { %v128_v39 = vpop.permute.xlu0 %127  ;;  %v133_v44 = vpop.permute.xlu1 %132 }
  0x9d   :  { %v138_v51 = vpop.permute.xlu0 %137  ;;  %v143_v56 = vpop.permute.xlu1 %142 }
  0xde   :  { %v1100_v3 = vpop.f32.mrb[0].mxu0 }
  0xdf   :  { %v265_v4 = vadd.f32 %v1100_v3, %v78_v61  ;;  %v256_v5 = vpop.f32.mrb[1].mxu0 }
  0xe0   :  { %v257_v7 = vadd.f32 %v256_v5, %v68_v60  ;;  %v1101_v8 = vpop.f32.mrb[2].mxu0  ;;  %v1506_v5 = vld [vmem:[%s1658_s3 + $0x8] sm:$0xff]  }
  0xe1   :  { %v268_v9 = vadd.f32 %v1101_v8, %v83_v63  ;;  %v259_v10 = vpop.f32.mrb[3].mxu0  ;;  %v321_v12 = vmax.f32 %v265_v4, 0.0  ;;  %v1523_v8 = vld [vmem:[%s1658_s3 + $0x20] sm:$0xff]  }
  0xe2   :  { %v260_v11 = vadd.f32 %v259_v10, %v73_v62  ;;  %v319_v15 = vmax.f32 %v257_v7, 0.0  ;;  %v1518_v7 = vld [vmem:[%s1658_s3 + $0x18] sm:$0xff]   ;;  %v1535_v10 = vld [vmem:[%s1658_s3 + $0x30] sm:$0xff]  }
  0xe3   :  { %v322_v13 = vmax.f32 %v268_v9, 0.0  ;;  %v1530_v9 = vld [vmem:[%s1658_s3 + $0x28] sm:$0xff]  }
  0xe4   :  { %v320_v16 = vmax.f32 %v260_v11, 0.0  ;;  %v1542_v11 = vld [vmem:[%s1658_s3 + $0x38] sm:$0xff]  }
  0xe5   :  { %v448_v17 = vpack.c.bf16 %v322_v13, %v321_v12  ;;  %v1546_v12 = vpop.permute.xlu0 %369  ;;  %v1548_v13 = vpop.permute.xlu1 %374 }
  0xe6   :  { %v1104_v19 = vpop.f32.mrb[4].mxu0  ;;  %v447_v20 = vpack.c.bf16 %v320_v16, %v319_v15 }
  0xe7   :  { %v281_v21 = vadd.f32 %v1104_v19, %v98_v2  ;;  %v272_v22 = vpop.f32.mrb[5].mxu0 }
  0xe8   :  { %v273_v23 = vadd.f32 %v272_v22, %v88_v0  ;;  %v1105_v24 = vpop.f32.mrb[6].mxu0  ;;  %1114 = vmatprep.subr.bf16.mxu1 %v447_v20 }
  0xe9   :  { %v284_v25 = vadd.f32 %v1105_v24, %v103_v6  ;;  %v275_v26 = vpop.f32.mrb[7].mxu0  ;;  %1115 = vmatpush3.bf16.msra.mxu1 %v447_v20  ;;  %v325_v29 = vmax.f32 %v281_v21, 0.0  ;;  %v1511_v6 = vld [vmem:[%s1658_s3 + $0x10] sm:$0xff]   ;;  %v1552_v15 = vpop.permute.xlu1 %384 }
  0xea   :  { %v276_v28 = vadd.f32 %v275_v26, %v93_v1  ;;  %1116 = vmatprep.subr.bf16.mxu1 %v448_v17  ;;  %v323_v32 = vmax.f32 %v273_v23, 0.0 }
  0xeb   :  { %v326_v30 = vmax.f32 %v284_v25, 0.0 }
  0xec   :  { %v324_v33 = vmax.f32 %v276_v28, 0.0 }
  0xed   :  { %v450_v34 = vpack.c.bf16 %v326_v30, %v325_v29  ;;  %1117 = vmatpush3.bf16.msra.mxu1 %v448_v17  ;;  %v1556_v17 = vpop.permute.xlu1 %394 }
  0xee   :  { %v449_v35 = vpack.c.bf16 %v324_v33, %v323_v32  ;;  %v1108_v36 = vpop.f32.mrb[8].mxu0 }
  0xef   :  { %v297_v37 = vadd.f32 %v1108_v36, %v118_v27  ;;  %v288_v38 = vpop.f32.mrb[9].mxu0 }
  0xf0   :  { %v289_v40 = vadd.f32 %v288_v38, %v108_v14  ;;  %v1109_v41 = vpop.f32.mrb[10].mxu0  ;;  %1118 = vmatprep.subr.bf16.mxu1 %v449_v35  ;;  %v1550_v14 = vpop.permute.xlu0 %379 }
  0xf1   :  { %v300_v42 = vadd.f32 %v1109_v41, %v123_v31  ;;  %v291_v43 = vpop.f32.mrb[11].mxu0  ;;  %1119 = vmatpush3.bf16.msra.mxu1 %v449_v35  ;;  %v329_v46 = vmax.f32 %v297_v37, 0.0  ;;  %v1561_v22 = vpop.permute.xlu1 %404 }
  0xf2   :  { %v292_v45 = vadd.f32 %v291_v43, %v113_v18  ;;  %1120 = vmatprep.subr.bf16.mxu1 %v450_v34  ;;  %v327_v48 = vmax.f32 %v289_v40, 0.0 }
  0xf3   :  { %v330_v47 = vmax.f32 %v300_v42, 0.0 }
  0xf4   :  { %v328_v49 = vmax.f32 %v292_v45, 0.0  ;;  %v1554_v16 = vpop.permute.xlu0 %389 }
  0xf5   :  { %v452_v50 = vpack.c.bf16 %v330_v47, %v329_v46  ;;  %1121 = vmatpush3.bf16.msra.mxu1 %v450_v34  ;;  %v1568_v34 = vpop.permute.xlu1 %414 }
  0xf6   :  { %v451_v52 = vpack.c.bf16 %v328_v49, %v327_v48  ;;  %v1112_v53 = vpop.f32.mrb[12].mxu0 }
  0xf7   :  { %v313_v54 = vadd.f32 %v1112_v53, %v138_v51  ;;  %v304_v55 = vpop.f32.mrb[13].mxu0 }
  0xf8   :  { %v305_v57 = vadd.f32 %v304_v55, %v128_v39  ;;  %v1113_v58 = vpop.f32.mrb[14].mxu0  ;;  %1122 = vmatprep.subr.bf16.mxu1 %v451_v52  ;;  %v1558_v18 = vpop.permute.xlu0 %399 }
  0xf9   :  { %v316_v60 = vadd.f32 %v1113_v58, %v143_v56  ;;  %v307_v61 = vpop.f32.mrb[15].mxu0  ;;  %1123 = vmatpush3.bf16.msra.mxu1 %v451_v52  ;;  %v333_v63 = vmax.f32 %v313_v54, 0.0  ;;  %v1576_v47 = vpop.permute.xlu1 %424 }
  0xfa   :  { %v308_v62 = vadd.f32 %v307_v61, %v133_v44  ;;  %1124 = vmatprep.subr.bf16.mxu1 %v452_v50  ;;  %v331_v1 = vmax.f32 %v305_v57, 0.0 }
  0xfb   :  { %v334_v0 = vmax.f32 %v316_v60, 0.0 }
  0xfc   :  { %v332_v2 = vmax.f32 %v308_v62, 0.0  ;;  %v1566_v30 = vpop.permute.xlu0 %409 }
  0xfd   :  { %v454_v3 = vpack.c.bf16 %v334_v0, %v333_v63  ;;  %1125 = vmatpush3.bf16.msra.mxu1 %v452_v50  ;;  %v1583_v61 = vpop.permute.xlu1 %434 }
  0xfe   :  { %v453_v4 = vpack.c.bf16 %v332_v2, %v331_v1 }
 0x100   :  { %1126 = vmatprep.subr.bf16.mxu1 %v453_v4  ;;  %v1573_v43 = vpop.permute.xlu0 %419 }
 0x101   :  { %1127 = vmatpush3.bf16.msra.mxu1 %v453_v4 }
 0x102   :  { %1128 = vmatprep.subr.bf16.mxu1 %v454_v3 }
 0x104   :  { %v1579_v55 = vpop.permute.xlu0 %429 }
 0x105   :  { %1129 = vmatpush3.bf16.msra.mxu1 %v454_v3 }
 0x108   :  { %1131 = vmatmul.mubr.bf16.vlgmr.msra.gmra.mrb[0].mxu1 %v1506_v5  ;;  %v1586_v4 = vpop.permute.xlu0 %439 }
 0x109   :  { %1134 = vmatprep.mubr.bf16.mxu1 %v1511_v6 }
 0x110   :  { %1135 = vmatmul.mubr.bf16.gmra.mrb[4].mxu1 %v1518_v7 }
 0x111   :  { %1138 = vmatprep.mubr.bf16.mxu1 %v1523_v8 }
 0x118   :  { %1139 = vmatmul.mubr.bf16.gmra.mrb[8].mxu1 %v1530_v9 }
 0x119   :  { %1142 = vmatprep.mubr.bf16.mxu1 %v1535_v10 }
 0x120   :  { %1143 = vmatmul.mubr.bf16.gmra.mrb[12].mxu1 %v1542_v11 }
 0x121   :  { %1198 = vmatprep.mubr.bf16.mxu1 %v1511_v6 }
 0x1db   :  { %v1132_v19 = vpop.f32.mrb[0].mxu1 }
 0x1dc   :  { %v546_v20 = vadd.f32 %v1132_v19, %v1550_v14  ;;  %v537_v21 = vpop.f32.mrb[1].mxu1 }
 0x1dd   :  { %v538_v23 = vadd.f32 %v537_v21, %v1546_v12  ;;  %v1133_v24 = vpop.f32.mrb[2].mxu1 }
 0x1de   :  { %v549_v25 = vadd.f32 %v1133_v24, %v1552_v15  ;;  %v540_v26 = vpop.f32.mrb[3].mxu1  ;;  %v602_v28 = vmax.f32 %v546_v20, 0.0  ;;  %v1589_v24 = vpop.permute.xlu1 %444 }
 0x1df   :  { %v541_v27 = vadd.f32 %v540_v26, %v1548_v13  ;;  %v600_v31 = vmax.f32 %v538_v23, 0.0 }
 0x1e0   :  { %v603_v29 = vmax.f32 %v549_v25, 0.0 }
 0x1e1   :  { %v601_v32 = vmax.f32 %v541_v27, 0.0 }
 0x1e2   :  { %v617_v33 = vpack.c.bf16 %v603_v29, %v602_v28 }
 0x1e3   :  { %v616_v35 = vpack.c.bf16 %v601_v32, %v600_v31  ;;  %v1136_v36 = vpop.f32.mrb[4].mxu1 }
 0x1e4   :  { %v562_v37 = vadd.f32 %v1136_v36, %v1558_v18  ;;  %v553_v38 = vpop.f32.mrb[5].mxu1 }
 0x1e5   :  { %v554_v39 = vadd.f32 %v553_v38, %v1554_v16  ;;  %v1137_v40 = vpop.f32.mrb[6].mxu1  ;;  %1146 = vmatprep.subr.bf16.mxu0 %v616_v35 }
 0x1e6   :  { %v565_v41 = vadd.f32 %v1137_v40, %v1561_v22  ;;  %v556_v42 = vpop.f32.mrb[7].mxu1  ;;  %1147 = vmatpush3.bf16.msra.mxu0 %v616_v35  ;;  %v606_v45 = vmax.f32 %v562_v37, 0.0 }
 0x1e7   :  { %v557_v44 = vadd.f32 %v556_v42, %v1556_v17  ;;  %1148 = vmatprep.subr.bf16.mxu0 %v617_v33  ;;  %v604_v48 = vmax.f32 %v554_v39, 0.0 }
 0x1e8   :  { %v607_v46 = vmax.f32 %v565_v41, 0.0 }
 0x1e9   :  { %v605_v49 = vmax.f32 %v557_v44, 0.0 }
 0x1ea   :  { %v619_v50 = vpack.c.bf16 %v607_v46, %v606_v45  ;;  %1149 = vmatpush3.bf16.msra.mxu0 %v617_v33 }
 0x1eb   :  { %v618_v51 = vpack.c.bf16 %v605_v49, %v604_v48  ;;  %v1140_v52 = vpop.f32.mrb[8].mxu1 }
 0x1ec   :  { %v578_v53 = vadd.f32 %v1140_v52, %v1573_v43  ;;  %v569_v54 = vpop.f32.mrb[9].mxu1 }
 0x1ed   :  { %v570_v56 = vadd.f32 %v569_v54, %v1566_v30  ;;  %v1141_v57 = vpop.f32.mrb[10].mxu1  ;;  %1150 = vmatprep.subr.bf16.mxu0 %v618_v51 }
 0x1ee   :  { %v581_v58 = vadd.f32 %v1141_v57, %v1576_v47  ;;  %v572_v60 = vpop.f32.mrb[11].mxu1  ;;  %1151 = vmatpush3.bf16.msra.mxu0 %v618_v51  ;;  %v610_v63 = vmax.f32 %v578_v53, 0.0 }
 0x1ef   :  { %v573_v62 = vadd.f32 %v572_v60, %v1568_v34  ;;  %1152 = vmatprep.subr.bf16.mxu0 %v619_v50  ;;  %v608_v1 = vmax.f32 %v570_v56, 0.0 }
 0x1f0   :  { %v611_v0 = vmax.f32 %v581_v58, 0.0 }
 0x1f1   :  { %v609_v2 = vmax.f32 %v573_v62, 0.0 }
 0x1f2   :  { %v621_v3 = vpack.c.bf16 %v611_v0, %v610_v63  ;;  %1153 = vmatpush3.bf16.msra.mxu0 %v619_v50 }
 0x1f3   :  { %v620_v19 = vpack.c.bf16 %v609_v2, %v608_v1  ;;  %v1144_v20 = vpop.f32.mrb[12].mxu1 }
 0x1f4   :  { %v594_v21 = vadd.f32 %v1144_v20, %v1586_v4  ;;  %v585_v23 = vpop.f32.mrb[13].mxu1 }
 0x1f5   :  { %v586_v25 = vadd.f32 %v585_v23, %v1579_v55  ;;  %v1145_v26 = vpop.f32.mrb[14].mxu1  ;;  %1154 = vmatprep.subr.bf16.mxu0 %v620_v19 }
 0x1f6   :  { %v597_v27 = vadd.f32 %v1145_v26, %v1589_v24  ;;  %v588_v28 = vpop.f32.mrb[15].mxu1  ;;  %1155 = vmatpush3.bf16.msra.mxu0 %v620_v19  ;;  %v614_v31 = vmax.f32 %v594_v21, 0.0 }
 0x1f7   :  { %v589_v29 = vadd.f32 %v588_v28, %v1583_v61  ;;  %1156 = vmatprep.subr.bf16.mxu0 %v621_v3  ;;  %v612_v33 = vmax.f32 %v586_v25, 0.0 }
 0x1f8   :  { %v615_v32 = vmax.f32 %v597_v27, 0.0 }
 0x1f9   :  { %v613_v35 = vmax.f32 %v589_v29, 0.0 }
 0x1fa   :  { %v623_v36 = vpack.c.bf16 %v615_v32, %v614_v31  ;;  %1157 = vmatpush3.bf16.msra.mxu0 %v621_v3 }
 0x1fb   :  { %v622_v37 = vpack.c.bf16 %v613_v35, %v612_v33 }
 0x1fd   :  { %1158 = vmatprep.subr.bf16.mxu0 %v622_v37 }
 0x1fe   :  { %1159 = vmatpush3.bf16.msra.mxu0 %v622_v37 }
 0x1ff   :  { %1160 = vmatprep.subr.bf16.mxu0 %v623_v36 }
 0x202   :  { %1161 = vmatpush3.bf16.msra.mxu0 %v623_v36 }
 0x205   :  { %1163 = vmatmul.mubr.bf16.vlgmr.msra.gmra.mrb[16].mxu0 %v1506_v5 }
 0x206   :  { %1166 = vmatprep.mubr.bf16.mxu0 %v1511_v6 }
 0x20d   :  { %1167 = vmatmul.mubr.bf16.gmra.mrb[20].mxu0 %v1518_v7 }
 0x20e   :  { %1170 = vmatprep.mubr.bf16.mxu0 %v1523_v8 }
 0x215   :  { %1171 = vmatmul.mubr.bf16.gmra.mrb[24].mxu0 %v1530_v9 }
 0x216   :  { %1174 = vmatprep.mubr.bf16.mxu0 %v1535_v10 }
 0x21d   :  { %1175 = vmatmul.mubr.bf16.gmra.mrb[28].mxu0 %v1542_v11 }
 0x21e   :  { %1194 = vmatprep.mubr.bf16.mxu0 %v1499_v59 }
 0x2d8   :  { %v1164_v38 = vpop.f32.mrb[16].mxu0 }
 0x2d9   :  { %v667_v39 = vadd.f32 %v1164_v38, %v1550_v14  ;;  %v658_v40 = vpop.f32.mrb[17].mxu0 }
 0x2da   :  { %v659_v41 = vadd.f32 %v658_v40, %v1546_v12  ;;  %v1165_v42 = vpop.f32.mrb[18].mxu0 }
 0x2db   :  { %v670_v6 = vadd.f32 %v1165_v42, %v1552_v15  ;;  %v661_v44 = vpop.f32.mrb[19].mxu0  ;;  %v723_v46 = vmax.f32 %v667_v39, 0.0 }
 0x2dc   :  { %v662_v45 = vadd.f32 %v661_v44, %v1548_v13  ;;  %v721_v49 = vmax.f32 %v659_v41, 0.0 }
 0x2dd   :  { %v724_v48 = vmax.f32 %v670_v6, 0.0 }
 0x2de   :  { %v722_v50 = vmax.f32 %v662_v45, 0.0 }
 0x2df   :  { %v738_v51 = vpack.c.bf16 %v724_v48, %v723_v46 }
 0x2e0   :  { %v737_v52 = vpack.c.bf16 %v722_v50, %v721_v49  ;;  %v1168_v53 = vpop.f32.mrb[20].mxu0 }
 0x2e1   :  { %v683_v59 = vadd.f32 %v1168_v53, %v1558_v18  ;;  %v674_v54 = vpop.f32.mrb[21].mxu0  ;;  %v877_v53 = vpop.permute.xlu0 %876 }
 0x2e2   :  { %v675_v56 = vadd.f32 %v674_v54, %v1554_v16  ;;  %v1169_v57 = vpop.f32.mrb[22].mxu0  ;;  %1178 = vmatprep.subr.bf16.mxu0 %v737_v52  ;;  %1210 = vmatprep.subr.bf16.mxu1 %v737_v52 }
 0x2e3   :  { %v686_v58 = vadd.f32 %v1169_v57, %v1561_v22  ;;  %v677_v60 = vpop.f32.mrb[23].mxu0  ;;  %1179 = vmatpush3.bf16.msra.mxu0 %v737_v52  ;;  %1218 = vmatpush3.bf16.msra.mxu1 %v737_v52  ;;  %v727_v63 = vmax.f32 %v683_v59, 0.0  ;;  %v882_v59 = vpop.permute.xlu1 %881 }
 0x2e4   :  { %v678_v62 = vadd.f32 %v677_v60, %v1556_v17  ;;  %1180 = vmatprep.subr.bf16.mxu0 %v738_v51  ;;  %1211 = vmatprep.subr.bf16.mxu1 %v738_v51  ;;  %v725_v1 = vmax.f32 %v675_v56, 0.0 }
 0x2e5   :  { %v728_v0 = vmax.f32 %v686_v58, 0.0  ;;  %v887_v54 = vpop.permute.xlu0 %886 }
 0x2e6   :  { %v726_v2 = vmax.f32 %v678_v62, 0.0 }
 0x2e7   :  { %v740_v3 = vpack.c.bf16 %v728_v0, %v727_v63  ;;  %1181 = vmatpush3.bf16.msra.mxu0 %v738_v51  ;;  %1219 = vmatpush3.bf16.msra.mxu1 %v738_v51  ;;  %v892_v56 = vpop.permute.xlu1 %891 }
 0x2e8   :  { %v739_v19 = vpack.c.bf16 %v726_v2, %v725_v1  ;;  %v1172_v20 = vpop.f32.mrb[24].mxu0 }
 0x2e9   :  { %v699_v21 = vadd.f32 %v1172_v20, %v1573_v43  ;;  %v690_v23 = vpop.f32.mrb[25].mxu0  ;;  %v897_v57 = vpop.permute.xlu0 %896 }
 0x2ea   :  { %v691_v25 = vadd.f32 %v690_v23, %v1566_v30  ;;  %v1173_v26 = vpop.f32.mrb[26].mxu0  ;;  %1182 = vmatprep.subr.bf16.mxu0 %v739_v19  ;;  %1212 = vmatprep.subr.bf16.mxu1 %v739_v19 }
 0x2eb   :  { %v702_v27 = vadd.f32 %v1173_v26, %v1576_v47  ;;  %v693_v28 = vpop.f32.mrb[27].mxu0  ;;  %1183 = vmatpush3.bf16.msra.mxu0 %v739_v19  ;;  %1220 = vmatpush3.bf16.msra.mxu1 %v739_v19  ;;  %v731_v31 = vmax.f32 %v699_v21, 0.0 }
 0x2ec   :  { %v694_v29 = vadd.f32 %v693_v28, %v1568_v34  ;;  %1184 = vmatprep.subr.bf16.mxu0 %v740_v3  ;;  %1213 = vmatprep.subr.bf16.mxu1 %v740_v3  ;;  %v729_v33 = vmax.f32 %v691_v25, 0.0 }
 0x2ed   :  { %v732_v32 = vmax.f32 %v702_v27, 0.0  ;;  %v907_v27 = vpop.permute.xlu0 %906 }
 0x2ee   :  { %v730_v35 = vmax.f32 %v694_v29, 0.0 }
 0x2ef   :  { %v742_v36 = vpack.c.bf16 %v732_v32, %v731_v31  ;;  %1185 = vmatpush3.bf16.msra.mxu0 %v740_v3  ;;  %1221 = vmatpush3.bf16.msra.mxu1 %v740_v3  ;;  %v902_v3 = vpop.permute.xlu1 %901 }
 0x2f0   :  { %v741_v37 = vpack.c.bf16 %v730_v35, %v729_v33  ;;  %v1176_v38 = vpop.f32.mrb[28].mxu0 }
 0x2f1   :  { %v715_v39 = vadd.f32 %v1176_v38, %v1586_v4  ;;  %v706_v40 = vpop.f32.mrb[29].mxu0 }
 0x2f2   :  { %v707_v41 = vadd.f32 %v706_v40, %v1579_v55  ;;  %v1177_v42 = vpop.f32.mrb[30].mxu0  ;;  %1186 = vmatprep.subr.bf16.mxu0 %v741_v37  ;;  %1214 = vmatprep.subr.bf16.mxu1 %v741_v37 }
 0x2f3   :  { %v718_v6 = vadd.f32 %v1177_v42, %v1589_v24  ;;  %v709_v44 = vpop.f32.mrb[31].mxu0  ;;  %1187 = vmatpush3.bf16.msra.mxu0 %v741_v37  ;;  %1222 = vmatpush3.bf16.msra.mxu1 %v741_v37  ;;  %v735_v46 = vmax.f32 %v715_v39, 0.0  ;;  %v917_v42 = vpop.permute.xlu0 %916 }
 0x2f4   :  { %v710_v45 = vadd.f32 %v709_v44, %v1583_v61  ;;  %1188 = vmatprep.subr.bf16.mxu0 %v742_v36  ;;  %1215 = vmatprep.subr.bf16.mxu1 %v742_v36  ;;  %v733_v49 = vmax.f32 %v707_v41, 0.0 }
 0x2f5   :  { %v736_v48 = vmax.f32 %v718_v6, 0.0 }
 0x2f6   :  { %v734_v50 = vmax.f32 %v710_v45, 0.0 }
 0x2f7   :  { %v744_v51 = vpack.c.bf16 %v736_v48, %v735_v46  ;;  %1189 = vmatpush3.bf16.msra.mxu0 %v742_v36  ;;  %1223 = vmatpush3.bf16.msra.mxu1 %v742_v36 }
 0x2f8   :  { %v743_v52 = vpack.c.bf16 %v734_v50, %v733_v49 }
 0x2fa   :  { %1190 = vmatprep.subr.bf16.mxu0 %v743_v52  ;;  %1216 = vmatprep.subr.bf16.mxu1 %v743_v52 }
 0x2fb   :  { %1191 = vmatpush3.bf16.msra.mxu0 %v743_v52  ;;  %1224 = vmatpush3.bf16.msra.mxu1 %v743_v52 }
 0x2fc   :  { %1192 = vmatprep.subr.bf16.mxu0 %v744_v51  ;;  %1217 = vmatprep.subr.bf16.mxu1 %v744_v51 }
 0x2ff   :  { %1193 = vmatpush3.bf16.msra.mxu0 %v744_v51  ;;  %1225 = vmatpush3.bf16.msra.mxu1 %v744_v51 }
 0x302   :  { %1195 = vmatmul.mubr.bf16.vlgmr.msra.gmra.mrb[32].mxu0 %v1506_v5  ;;  %1199 = vmatmul.mubr.bf16.vlgmr.msra.gmra.mrb[16].mxu1 %v1518_v7 }
 0x303   :  { %1202 = vmatprep.mubr.bf16.mxu1 %v1523_v8 }
 0x30a   :  { %1203 = vmatmul.mubr.bf16.gmra.mrb[20].mxu1 %v1530_v9 }
 0x30b   :  { %1206 = vmatprep.mubr.bf16.mxu1 %v1535_v10 }
 0x312   :  { %1207 = vmatmul.mubr.bf16.gmra.mrb[24].mxu1 %v1542_v11 }
 0x3d5   :  { %v1196_v58 = vpop.f32.mrb[32].mxu0  ;;  %v1200_v60 = vpop.f32.mrb[16].mxu1 }
 0x3d6   :  { %v779_v62 = vpop.f32.mrb[33].mxu0  ;;  %v795_v63 = vpop.f32.mrb[17].mxu1  ;;  %v788_v5 = vadd.f32 %v1196_v58, %v1550_v14  ;;  %v804_v31 = vadd.f32 %v1200_v60, %v1558_v18 }
 0x3d7   :  { %v780_v7 = vadd.f32 %v779_v62, %v1546_v12  ;;  %v1197_v8 = vpop.f32.mrb[34].mxu0  ;;  %v1201_v0 = vpop.f32.mrb[18].mxu1  ;;  %v796_v20 = vadd.f32 %v795_v63, %v1554_v16 }
 0x3d8   :  { %v782_v9 = vpop.f32.mrb[35].mxu0  ;;  %v798_v1 = vpop.f32.mrb[19].mxu1  ;;  %v791_v11 = vadd.f32 %v1197_v8, %v1552_v15  ;;  %v844_v19 = vmax.f32 %v788_v5, 0.0  ;;  %v807_v16 = vadd.f32 %v1201_v0, %v1561_v22  ;;  %v848_v39 = vmax.f32 %v804_v31, 0.0 }
 0x3d9   :  { %v842_v10 = vmax.f32 %v780_v7, 0.0  ;;  %v783_v2 = vadd.f32 %v782_v9, %v1548_v13  ;;  %v799_v14 = vadd.f32 %v798_v1, %v1556_v17  ;;  %v846_v32 = vmax.f32 %v796_v20, 0.0  ;;  %v912_v13 = vpop.permute.xlu1 %911  ;;  %v927_v58 = vpop.permute.xlu0 %926 }
 0x3da   :  { %v845_v25 = vmax.f32 %v791_v11, 0.0  ;;  %v956_v29 = vmul.f32 %v887_v54, %v844_v19  ;;  %v849_v6 = vmax.f32 %v807_v16, 0.0  ;;  %v960_v50 = vmul.f32 %v907_v27, %v848_v39 }
 0x3db   :  { %v843_v21 = vmax.f32 %v783_v2, 0.0  ;;  %v954_v23 = vmul.f32 %v877_v53, %v842_v10  ;;  %v847_v38 = vmax.f32 %v799_v14, 0.0  ;;  %v958_v40 = vmul.f32 %v897_v57, %v846_v32 }
 0x3dc   :  { %v957_v36 = vmul.f32 %v892_v56, %v845_v25  ;;  %v961_v54 = vmul.f32 %v912_v13, %v849_v6 }
 0x3dd   :  { %v955_v26 = vmul.f32 %v882_v59, %v843_v21  ;;  %v1204_v12 = vpop.f32.mrb[20].mxu1  ;;  %v959_v44 = vmul.f32 %v902_v3, %v847_v38  ;;  %v922_v48 = vpop.permute.xlu1 %921 }
 0x3de   :  { %v811_v28 = vpop.f32.mrb[21].mxu1  ;;  %v820_v22 = vadd.f32 %v1204_v12, %v1573_v43  ;;  %v937_v2 = vpop.permute.xlu0 %936 }
 0x3df   :  { %v970_v15 = vadd.f32 %v955_v26, %v954_v23  ;;  %v1205_v33 = vpop.f32.mrb[22].mxu1  ;;  %v812_v17 = vadd.f32 %v811_v28, %v1566_v30 }
 0x3e0   :  { %v814_v35 = vpop.f32.mrb[23].mxu1  ;;  %v823_v30 = vadd.f32 %v1205_v33, %v1576_v47  ;;  %v852_v60 = vmax.f32 %v820_v22, 0.0 }
 0x3e1   :  { %v971_v37 = vadd.f32 %v970_v15, %v956_v29  ;;  %v815_v18 = vadd.f32 %v814_v35, %v1568_v34  ;;  %v850_v52 = vmax.f32 %v812_v17, 0.0  ;;  %v932_v5 = vpop.permute.xlu1 %931 }
 0x3e2   :  { %v853_v8 = vmax.f32 %v823_v30, 0.0  ;;  %v964_v9 = vmul.f32 %v927_v58, %v852_v60  ;;  %v947_v27 = vpop.permute.xlu0 %946 }
 0x3e3   :  { %v972_v41 = vadd.f32 %v971_v37, %v957_v36  ;;  %v851_v57 = vmax.f32 %v815_v18, 0.0  ;;  %v962_v62 = vmul.f32 %v917_v42, %v850_v52  ;;  %v992_v36 = vstv %s1661_s6 }
 0x3e4   :  { %v965_v47 = vmul.f32 %v932_v5, %v853_v8 }
 0x3e5   :  { %v973_v45 = vadd.f32 %v972_v41, %v958_v40  ;;  %v1208_v46 = vpop.f32.mrb[24].mxu1  ;;  %v963_v0 = vmul.f32 %v922_v48, %v851_v57  ;;  %v942_v21 = vpop.permute.xlu1 %941 }
 0x3e6   :  { %v827_v49 = vpop.f32.mrb[25].mxu1  ;;  %v836_v10 = vadd.f32 %v1208_v46, %v1586_v4 }
 0x3e7   :  { %v974_v51 = vadd.f32 %v973_v45, %v959_v44  ;;  %v1209_v53 = vpop.f32.mrb[26].mxu1  ;;  %v828_v34 = vadd.f32 %v827_v49, %v1579_v55 }
 0x3e8   :  { %v830_v59 = vpop.f32.mrb[27].mxu1  ;;  %v839_v19 = vadd.f32 %v1209_v53, %v1589_v24  ;;  %v856_v23 = vmax.f32 %v836_v10, 0.0 }
 0x3e9   :  { %v975_v56 = vadd.f32 %v974_v51, %v960_v50  ;;  %v831_v43 = vadd.f32 %v830_v59, %v1583_v61  ;;  %v854_v11 = vmax.f32 %v828_v34, 0.0  ;;  %v952_v29 = vpop.permute.xlu1 %951 }
 0x3ea   :  { %v857_v14 = vmax.f32 %v839_v19, 0.0  ;;  %v968_v61 = vmul.f32 %v947_v27, %v856_v23 }
 0x3eb   :  { %v976_v63 = vadd.f32 %v975_v56, %v961_v54  ;;  %v855_v20 = vmax.f32 %v831_v43, 0.0  ;;  %v966_v55 = vmul.f32 %v937_v2, %v854_v11 }
 0x3ec   :  { %v969_v31 = vmul.f32 %v952_v29, %v857_v14 }
 0x3ed   :  { %v977_v7 = vadd.f32 %v976_v63, %v962_v62  ;;  %v967_v12 = vmul.f32 %v942_v21, %v855_v20 }
 0x3ef   :  { %v978_v1 = vadd.f32 %v977_v7, %v963_v0 }
 0x3f1   :  { %v979_v3 = vadd.f32 %v978_v1, %v964_v9 }
 0x3f3   :  { %v980_v25 = vadd.f32 %v979_v3, %v965_v47 }
 0x3f5   :  { %v981_v26 = vadd.f32 %v980_v25, %v966_v55 }
 0x3f7   :  { %v982_v28 = vadd.f32 %v981_v26, %v967_v12 }
 0x3f9   :  { %v983_v4 = vadd.f32 %v982_v28, %v968_v61 }
 0x3fb   :  { %v984_v32 = vadd.f32 %v983_v4, %v969_v31 }
 0x3fd   :  { %v985_v15 = vrot.slane %v984_v32, 4 }
 0x3ff   :  { %v986_v33 = vadd.f32 %v985_v15, %v984_v32 }
 0x401   :  { %v987_v13 = vrot.slane %v986_v33, 2 }
 0x403   :  { %v988_v35 = vadd.f32 %v987_v13, %v986_v33 }
 0x405   :  { %v989_v24 = vrot.slane %v988_v35, 1 }
 0x407   :  { %v990_v16 = vadd.f32 %v989_v24, %v988_v35 }
 0x409   :  { %v993_v37 = vadd.f32 %v992_v36, %v990_v16 }
 0x40b   :  { %v994_v38 = vmax.f32 %v993_v37, 0.0 }
 0x40d   :  { %995 = vst [vmem:[#allocation3] sm:$0x1] %v994_v38 }
 0x40e   :  { %1259 = shalt.err (!%p1256_p4)
}
 0x40f   :  { %s1260_s10 = scalar_lea.hbm %s1662_s7, 16 }
 0x410   :  { %p1261_p5 = scmp.ne.s32.totalorder %s1662_s7, %s1260_s10  ;;  %p1264_p6 = scmp.lt.u32.totalorder %s1260_s10, %s1662_s7 }
 0x412   :  { %p1266_p7 = pnand %p1264_p6, %p1261_p5 }
 0x414   :  { %1269 = shalt.err (!%p1266_p7)
}
 0x415   :  { %1005 = dma.vmem_to_hbm [thread:$0]  %s1003_s29, 16, %s1662_s7, [#allocation4]  }
 0x416   :  { %1270 = dma.done.wait [#allocation4], 16  }
 0x417   :  { %1271 = vsyncadd [#allocation4], 4294967280 }
 0x418   :  { %1009 = vsyncpa [#allocation4], 1 }

</bundles_post_ra>
